<compile_context>
chip_gen: v7x
topology: tpu7x:2x2x1
jax: 0.10.0
libtpu: 0.0.40
codegen_flags: <defaults>
</compile_context>

<pallas_src>
import functools

import jax
import jax.numpy as jnp
from jax.experimental import pallas as pl
from jax.experimental.pallas import tpu as pltpu


def _round_up(n, m):
    return (n + m - 1) // m * m


_VMEM_BUDGET_BYTES = 12 * 1024 * 1024  # stay under v5e's 16 MiB scoped default


def _choose_tb(b, nz):
    """Batch tile: VMEM-budget derived, >=2 grid steps when batch allows."""
    lane = lambda n: _round_up(max(n, 1), 128)
    # Double-buffered f32 per-row bytes: x tile + net tile + scale tile
    # (minor dim is lane-padded to 128 in VMEM layout).
    per_row = 2 * 4 * (lane(nz) + lane(nz) + lane(1))
    tb_cap = max(8, (_VMEM_BUDGET_BYTES // per_row) // 8 * 8)
    # Prefer >=2 grid steps so v7x's two TensorCores both get work
    # (the "parallel" batch axis only shards if the grid has >=2 steps).
    tb = min(tb_cap, _round_up(max(-(-b // 2), 8), 8))
    return tb


def _generator_kernel(x_ref,
                      wA_ref, bA_ref,
                      wB_ref, bB_ref,
                      wC_ref, bC_ref,
                      wDn_ref, bDn_ref,
                      wS_ref, bS_ref,
                      net_ref, scale_ref):
    x = x_ref[...]

    def linear(h, w_ref, b_ref):
        return jnp.dot(h, w_ref[...], preferred_element_type=jnp.float32) + b_ref[...]

    # Fused first layer of both branches: [L1 | Ls1] + ReLU.
    y = jnp.maximum(linear(x, wA_ref, bA_ref), 0.0)       # (TB, 2*nz)
    # Middle net layers; scale activation is carried through an identity block
    # (ReLU is a no-op on it since it is already non-negative).
    y = jnp.maximum(linear(y, wB_ref, bB_ref), 0.0)        # (TB, 2*nz)
    y = jnp.maximum(linear(y, wC_ref, bC_ref), 0.0)        # (TB, 2*nz)

    # Net output: (2nz, nz) weight whose bottom half is zero.
    net_ref[...] = linear(y, wDn_ref, bDn_ref).astype(net_ref.dtype)

    # Scale output: dot product over the scale half of y (top half of wS is
    # zero), done as VPU multiply + lane reduce (no N=1 MXU matmul), then
    # softplus (PyTorch threshold=20 semantics).
    z = jnp.sum(y * wS_ref[...], axis=-1, keepdims=True) + bS_ref[...]   # (TB, 1)
    sp = jnp.where(z > 20.0, z, jnp.log1p(jnp.exp(jnp.minimum(z, 20.0))))
    scale_ref[...] = sp.astype(scale_ref.dtype)


@functools.partial(jax.jit, static_argnames=("nz", "tb"))
def _generator_pallas(x_padded, packed, nz, tb):
    bp, _ = x_padded.shape
    grid = (bp // tb,)

    def const_spec(arr):
        # Constant index_map keeps the (tiny) fused weights VMEM-resident
        # across the whole grid loop.
        return pl.BlockSpec(arr.shape, lambda i: (0, 0))

    in_specs = [
        pl.BlockSpec((tb, nz), lambda i: (i, 0)),
        const_spec(packed["wA"]), const_spec(packed["bA"]),
        const_spec(packed["wB"]), const_spec(packed["bB"]),
        const_spec(packed["wC"]), const_spec(packed["bC"]),
        const_spec(packed["wDn"]), const_spec(packed["bDn"]),
        const_spec(packed["wS"]), const_spec(packed["bS"]),
    ]
    out_specs = (
        pl.BlockSpec((tb, nz), lambda i: (i, 0)),   # net
        pl.BlockSpec((tb, 1), lambda i: (i, 0)),    # scale
    )
    out_shape = (
        jax.ShapeDtypeStruct((bp, nz), jnp.float32),
        jax.ShapeDtypeStruct((bp, 1), jnp.float32),
    )

    return pl.pallas_call(
        _generator_kernel,
        grid=grid,
        in_specs=in_specs,
        out_specs=out_specs,
        out_shape=out_shape,
        compiler_params=pltpu.CompilerParams(
            dimension_semantics=("parallel",)),
    )(x_padded,
      packed["wA"], packed["bA"],
      packed["wB"], packed["bB"],
      packed["wC"], packed["bC"],
      packed["wDn"], packed["bDn"],
      packed["wS"], packed["bS"])


def generator_forward(x, packed, nz):
    """x: [B, nz] f32.  packed: output of pack_generator_params.  Returns (net, scale)."""
    b = x.shape[0]
    tb = _choose_tb(b, nz)
    bp = _round_up(b, tb)
    if bp != b:
        x = jnp.pad(x, ((0, bp - b), (0, 0)))
    net, scale = _generator_pallas(x, packed, nz, tb)
    if bp != b:
        net, scale = net[:b], scale[:b]   # major-dim slice only (cheap)
    return net, scale


def init_generator_params(key, nz):
    """PyTorch-style nn.Linear params: weight (out, in), bias (out,), U(±1/sqrt(fan_in))."""
    def linear_init(k, fan_in, fan_out):
        kw, kb = jax.random.split(k)
        bound = 1.0 / (fan_in ** 0.5)
        w = jax.random.uniform(kw, (fan_out, fan_in), jnp.float32, -bound, bound)
        b = jax.random.uniform(kb, (fan_out,), jnp.float32, -bound, bound)
        return w, b

    keys = jax.random.split(key, 6)
    w1, b1 = linear_init(keys[0], nz, nz)
    w2, b2 = linear_init(keys[1], nz, nz)
    w3, b3 = linear_init(keys[2], nz, nz)
    w4, b4 = linear_init(keys[3], nz, nz)
    ws1, bs1 = linear_init(keys[4], nz, nz)
    ws2, bs2 = linear_init(keys[5], nz, 1)
    return dict(w1=w1, b1=b1, w2=w2, b2=b2, w3=w3, b3=b3, w4=w4, b4=b4,
                ws1=ws1, bs1=bs1, ws2=ws2, bs2=bs2)


def pack_generator_params(p, nz):
    """Fuse / transpose PyTorch-style params into the kernel layout."""
    f32 = jnp.float32
    eye = jnp.eye(nz, dtype=f32)
    zz = jnp.zeros((nz, nz), f32)

    # Layer A: fused first layers of both branches  -> (nz, 2*nz).
    wA = jnp.concatenate([p["w1"].T, p["ws1"].T], axis=1)
    bA = jnp.concatenate([p["b1"], p["bs1"]])[None, :]

    # Middle layers: block-diag(w, I) so the scale activation passes through.
    def mid(w, b):
        wt = w.T
        W = jnp.concatenate([jnp.concatenate([wt, zz], axis=1),
                             jnp.concatenate([zz, eye], axis=1)], axis=0)
        bb = jnp.concatenate([b, jnp.zeros((nz,), f32)])[None, :]
        return W, bb

    wB, bB = mid(p["w2"], p["b2"])
    wC, bC = mid(p["w3"], p["b3"])

    # Net final layer: (2nz, nz), bottom half zero (net ignores scale half).
    wDn = jnp.concatenate([p["w4"].T, jnp.zeros((nz, nz), f32)], axis=0)
    bDn = p["b4"][None, :]                                           # (1, nz)

    # Scale final layer as a (1, 2nz) row (zeros over the net half) + (1, 1) bias.
    wS = jnp.concatenate([jnp.zeros((1, nz), f32), p["ws2"]], axis=1)
    bS = p["bs2"][None, :]                                           # (1, 1)

    return dict(wA=wA, bA=bA, wB=wB, bB=bB, wC=wC, bC=bC,
                wDn=wDn, bDn=bDn, wS=wS, bS=bS)


def generator_reference(x, p):
    """Pure-JAX reference of the PyTorch forward (unfused), for correctness."""
    def lin(h, w, b):
        return h @ w.T + b
    h = jax.nn.relu(lin(x, p["w1"], p["b1"]))
    h = jax.nn.relu(lin(h, p["w2"], p["b2"]))
    h = jax.nn.relu(lin(h, p["w3"], p["b3"]))
    net = lin(h, p["w4"], p["b4"])
    s = jax.nn.relu(lin(x, p["ws1"], p["bs1"]))
    scale = jax.nn.softplus(lin(s, p["ws2"], p["bs2"]))
    return net, scale


if __name__ == "__main__":
    nz = 32
    hidden = 64   # present in the PyTorch ctor, unused by forward
    batch = 8

    key = jax.random.PRNGKey(0)
    k_params, k_x = jax.random.split(key)
    params = init_generator_params(k_params, nz)
    packed = pack_generator_params(params, nz)
    x = jax.random.normal(k_x, (batch, nz), jnp.float32)

    out_net, out_scale = generator_forward(x, packed, nz)
    jax.block_until_ready((out_net, out_scale))

    ref_net, ref_scale = generator_reference(x, params)
    assert out_net.shape == (batch, nz)
    assert out_scale.shape == (batch, 1)
    assert jnp.allclose(out_net, ref_net, atol=1e-5, rtol=1e-5)
    assert jnp.allclose(out_scale, ref_scale, atol=1e-5, rtol=1e-5)

    print("KERNEL_OK")
</pallas_src>

<mosaic_0001>
module attributes {stable_mosaic.version = 11 : i64} {
  func.func @_generator_kernel(%arg0: i32, %arg1: memref<8x32xf32, #tpu.memory_space<vmem>>, %arg2: memref<32x64xf32, #tpu.memory_space<vmem>>, %arg3: memref<1x64xf32, #tpu.memory_space<vmem>>, %arg4: memref<64x64xf32, #tpu.memory_space<vmem>>, %arg5: memref<1x64xf32, #tpu.memory_space<vmem>>, %arg6: memref<64x64xf32, #tpu.memory_space<vmem>>, %arg7: memref<1x64xf32, #tpu.memory_space<vmem>>, %arg8: memref<64x32xf32, #tpu.memory_space<vmem>>, %arg9: memref<1x32xf32, #tpu.memory_space<vmem>>, %arg10: memref<1x64xf32, #tpu.memory_space<vmem>>, %arg11: memref<1x1xf32, #tpu.memory_space<vmem>>, %arg12: memref<8x32xf32, #tpu.memory_space<vmem>>, %arg13: memref<8x1xf32, #tpu.memory_space<vmem>>) attributes {dimension_semantics = [#tpu.dimension_semantics<parallel>], iteration_bounds = array<i64: 1>, scalar_prefetch = 0 : i64, scratch_operands = 0 : i64, tpu.core_type = #tpu.core_type<tc>, window_params = [{transform_indices = @transform_0, window_bounds = array<i64: 8, 32>}, {pipeline_mode = #tpu.pipeline_mode<synchronous>, transform_indices = @transform_1, window_bounds = array<i64: 32, 64>}, {pipeline_mode = #tpu.pipeline_mode<synchronous>, transform_indices = @transform_2, window_bounds = array<i64: 1, 64>}, {pipeline_mode = #tpu.pipeline_mode<synchronous>, transform_indices = @transform_3, window_bounds = array<i64: 64, 64>}, {pipeline_mode = #tpu.pipeline_mode<synchronous>, transform_indices = @transform_4, window_bounds = array<i64: 1, 64>}, {pipeline_mode = #tpu.pipeline_mode<synchronous>, transform_indices = @transform_5, window_bounds = array<i64: 64, 64>}, {pipeline_mode = #tpu.pipeline_mode<synchronous>, transform_indices = @transform_6, window_bounds = array<i64: 1, 64>}, {pipeline_mode = #tpu.pipeline_mode<synchronous>, transform_indices = @transform_7, window_bounds = array<i64: 64, 32>}, {pipeline_mode = #tpu.pipeline_mode<synchronous>, transform_indices = @transform_8, window_bounds = array<i64: 1, 32>}, {pipeline_mode = #tpu.pipeline_mode<synchronous>, transform_indices = @transform_9, window_bounds = array<i64: 1, 64>}, {pipeline_mode = #tpu.pipeline_mode<synchronous>, transform_indices = @transform_10, window_bounds = array<i64: 1, 1>}, {transform_indices = @transform_11, window_bounds = array<i64: 8, 32>}, {transform_indices = @transform_12, window_bounds = array<i64: 8, 1>}]} {
    %c0 = arith.constant 0 : index
    %c0_0 = arith.constant 0 : index
    %0 = vector.load %arg1[%c0, %c0_0] : memref<8x32xf32, #tpu.memory_space<vmem>>, vector<8x32xf32>
    %c0_1 = arith.constant 0 : index
    %c0_2 = arith.constant 0 : index
    %1 = vector.load %arg2[%c0_1, %c0_2] : memref<32x64xf32, #tpu.memory_space<vmem>>, vector<32x64xf32>
    %cst = arith.constant dense<0.000000e+00> : vector<8x64xf32>
    %2 = tpu.matmul %0, %1, %cst {dimension_numbers = #tpu.dot_dimension_numbers<[1], [0], [0], [1], [0, 0, 1, 1], [], []>} : vector<8x32xf32>, vector<32x64xf32>, vector<8x64xf32> -> vector<8x64xf32>
    %c0_3 = arith.constant 0 : index
    %c0_4 = arith.constant 0 : index
    %3 = vector.load %arg3[%c0_3, %c0_4] : memref<1x64xf32, #tpu.memory_space<vmem>>, vector<1x64xf32>
    %4 = vector.broadcast %3 : vector<1x64xf32> to vector<8x64xf32>
    %5 = arith.addf %2, %4 : vector<8x64xf32>
    %cst_5 = arith.constant 0.000000e+00 : f32
    %6 = vector.broadcast %cst_5 : f32 to vector<8x64xf32>
    %7 = arith.maximumf %5, %6 : vector<8x64xf32>
    %c0_6 = arith.constant 0 : index
    %c0_7 = arith.constant 0 : index
    %8 = vector.load %arg4[%c0_6, %c0_7] : memref<64x64xf32, #tpu.memory_space<vmem>>, vector<64x64xf32>
    %cst_8 = arith.constant dense<0.000000e+00> : vector<8x64xf32>
    %9 = tpu.matmul %7, %8, %cst_8 {dimension_numbers = #tpu.dot_dimension_numbers<[1], [0], [0], [1], [0, 0, 1, 1], [], []>} : vector<8x64xf32>, vector<64x64xf32>, vector<8x64xf32> -> vector<8x64xf32>
    %c0_9 = arith.constant 0 : index
    %c0_10 = arith.constant 0 : index
    %10 = vector.load %arg5[%c0_9, %c0_10] : memref<1x64xf32, #tpu.memory_space<vmem>>, vector<1x64xf32>
    %11 = vector.broadcast %10 : vector<1x64xf32> to vector<8x64xf32>
    %12 = arith.addf %9, %11 : vector<8x64xf32>
    %cst_11 = arith.constant 0.000000e+00 : f32
    %13 = vector.broadcast %cst_11 : f32 to vector<8x64xf32>
    %14 = arith.maximumf %12, %13 : vector<8x64xf32>
    %c0_12 = arith.constant 0 : index
    %c0_13 = arith.constant 0 : index
    %15 = vector.load %arg6[%c0_12, %c0_13] : memref<64x64xf32, #tpu.memory_space<vmem>>, vector<64x64xf32>
    %cst_14 = arith.constant dense<0.000000e+00> : vector<8x64xf32>
    %16 = tpu.matmul %14, %15, %cst_14 {dimension_numbers = #tpu.dot_dimension_numbers<[1], [0], [0], [1], [0, 0, 1, 1], [], []>} : vector<8x64xf32>, vector<64x64xf32>, vector<8x64xf32> -> vector<8x64xf32>
    %c0_15 = arith.constant 0 : index
    %c0_16 = arith.constant 0 : index
    %17 = vector.load %arg7[%c0_15, %c0_16] : memref<1x64xf32, #tpu.memory_space<vmem>>, vector<1x64xf32>
    %18 = vector.broadcast %17 : vector<1x64xf32> to vector<8x64xf32>
    %19 = arith.addf %16, %18 : vector<8x64xf32>
    %cst_17 = arith.constant 0.000000e+00 : f32
    %20 = vector.broadcast %cst_17 : f32 to vector<8x64xf32>
    %21 = arith.maximumf %19, %20 : vector<8x64xf32>
    %c0_18 = arith.constant 0 : index
    %c0_19 = arith.constant 0 : index
    %22 = vector.load %arg8[%c0_18, %c0_19] : memref<64x32xf32, #tpu.memory_space<vmem>>, vector<64x32xf32>
    %cst_20 = arith.constant dense<0.000000e+00> : vector<8x32xf32>
    %23 = tpu.matmul %21, %22, %cst_20 {dimension_numbers = #tpu.dot_dimension_numbers<[1], [0], [0], [1], [0, 0, 1, 1], [], []>} : vector<8x64xf32>, vector<64x32xf32>, vector<8x32xf32> -> vector<8x32xf32>
    %c0_21 = arith.constant 0 : index
    %c0_22 = arith.constant 0 : index
    %24 = vector.load %arg9[%c0_21, %c0_22] : memref<1x32xf32, #tpu.memory_space<vmem>>, vector<1x32xf32>
    %25 = vector.broadcast %24 : vector<1x32xf32> to vector<8x32xf32>
    %26 = arith.addf %23, %25 : vector<8x32xf32>
    %c0_23 = arith.constant 0 : index
    %c0_24 = arith.constant 0 : index
    %27 = vector.load %arg12[%c0_23, %c0_24] : memref<8x32xf32, #tpu.memory_space<vmem>>, vector<8x32xf32>
    tpu.vector_store %arg12[%c0_23, %c0_24], %26 {strides = array<i32>} : memref<8x32xf32, #tpu.memory_space<vmem>>, vector<8x32xf32>,
    %c0_25 = arith.constant 0 : index
    %c0_26 = arith.constant 0 : index
    %28 = vector.load %arg10[%c0_25, %c0_26] : memref<1x64xf32, #tpu.memory_space<vmem>>, vector<1x64xf32>
    %29 = vector.broadcast %28 : vector<1x64xf32> to vector<8x64xf32>
    %30 = arith.mulf %21, %29 : vector<8x64xf32>
    %cst_27 = arith.constant dense<0.000000e+00> : vector<8xf32>
    %31 = vector.multi_reduction <add>, %30, %cst_27 [1] : vector<8x64xf32> to vector<8xf32>
    %32 = vector.shape_cast %31 : vector<8xf32> to vector<8x1xf32>
    %c0_28 = arith.constant 0 : index
    %c0_29 = arith.constant 0 : index
    %33 = vector.load %arg11[%c0_28, %c0_29] : memref<1x1xf32, #tpu.memory_space<vmem>>, vector<1x1xf32>
    %34 = vector.broadcast %33 : vector<1x1xf32> to vector<8x1xf32>
    %35 = arith.addf %32, %34 : vector<8x1xf32>
    %cst_30 = arith.constant 2.000000e+01 : f32
    %36 = vector.broadcast %cst_30 : f32 to vector<8x1xf32>
    %37 = arith.cmpf ogt, %35, %36 : vector<8x1xf32>
    %cst_31 = arith.constant 2.000000e+01 : f32
    %38 = vector.broadcast %cst_31 : f32 to vector<8x1xf32>
    %39 = arith.minimumf %35, %38 : vector<8x1xf32>
    %40 = math.exp %39 : vector<8x1xf32>
    %41 = math.log1p %40 : vector<8x1xf32>
    %42 = arith.select %37, %35, %41 : vector<8x1xi1>, vector<8x1xf32>
    %c0_32 = arith.constant 0 : index
    %c0_33 = arith.constant 0 : index
    %43 = vector.load %arg13[%c0_32, %c0_33] : memref<8x1xf32, #tpu.memory_space<vmem>>, vector<8x1xf32>
    tpu.vector_store %arg13[%c0_32, %c0_33], %42 {strides = array<i32>} : memref<8x1xf32, #tpu.memory_space<vmem>>, vector<8x1xf32>,
    return
  }
  func.func @transform_0(%arg0: i32) -> (i32, i32) {
    %c0_i32 = arith.constant 0 : i32
    %c0_i32_0 = arith.constant 0 : i32
    return %arg0, %c0_i32 : i32, i32
  }
  func.func @transform_1(%arg0: i32) -> (i32, i32) {
    %c0_i32 = arith.constant 0 : i32
    %c0_i32_0 = arith.constant 0 : i32
    %c0_i32_1 = arith.constant 0 : i32
    return %c0_i32, %c0_i32_0 : i32, i32
  }
  func.func @transform_2(%arg0: i32) -> (i32, i32) {
    %c0_i32 = arith.constant 0 : i32
    %c0_i32_0 = arith.constant 0 : i32
    %c0_i32_1 = arith.constant 0 : i32
    return %c0_i32, %c0_i32_0 : i32, i32
  }
  func.func @transform_3(%arg0: i32) -> (i32, i32) {
    %c0_i32 = arith.constant 0 : i32
    %c0_i32_0 = arith.constant 0 : i32
    %c0_i32_1 = arith.constant 0 : i32
    return %c0_i32, %c0_i32_0 : i32, i32
  }
  func.func @transform_4(%arg0: i32) -> (i32, i32) {
    %c0_i32 = arith.constant 0 : i32
    %c0_i32_0 = arith.constant 0 : i32
    %c0_i32_1 = arith.constant 0 : i32
    return %c0_i32, %c0_i32_0 : i32, i32
  }
  func.func @transform_5(%arg0: i32) -> (i32, i32) {
    %c0_i32 = arith.constant 0 : i32
    %c0_i32_0 = arith.constant 0 : i32
    %c0_i32_1 = arith.constant 0 : i32
    return %c0_i32, %c0_i32_0 : i32, i32
  }
  func.func @transform_6(%arg0: i32) -> (i32, i32) {
    %c0_i32 = arith.constant 0 : i32
    %c0_i32_0 = arith.constant 0 : i32
    %c0_i32_1 = arith.constant 0 : i32
    return %c0_i32, %c0_i32_0 : i32, i32
  }
  func.func @transform_7(%arg0: i32) -> (i32, i32) {
    %c0_i32 = arith.constant 0 : i32
    %c0_i32_0 = arith.constant 0 : i32
    %c0_i32_1 = arith.constant 0 : i32
    return %c0_i32, %c0_i32_0 : i32, i32
  }
  func.func @transform_8(%arg0: i32) -> (i32, i32) {
    %c0_i32 = arith.constant 0 : i32
    %c0_i32_0 = arith.constant 0 : i32
    %c0_i32_1 = arith.constant 0 : i32
    return %c0_i32, %c0_i32_0 : i32, i32
  }
  func.func @transform_9(%arg0: i32) -> (i32, i32) {
    %c0_i32 = arith.constant 0 : i32
    %c0_i32_0 = arith.constant 0 : i32
    %c0_i32_1 = arith.constant 0 : i32
    return %c0_i32, %c0_i32_0 : i32, i32
  }
  func.func @transform_10(%arg0: i32) -> (i32, i32) {
    %c0_i32 = arith.constant 0 : i32
    %c0_i32_0 = arith.constant 0 : i32
    %c0_i32_1 = arith.constant 0 : i32
    return %c0_i32, %c0_i32_0 : i32, i32
  }
  func.func @transform_11(%arg0: i32) -> (i32, i32) {
    %c0_i32 = arith.constant 0 : i32
    %c0_i32_0 = arith.constant 0 : i32
    return %arg0, %c0_i32 : i32, i32
  }
  func.func @transform_12(%arg0: i32) -> (i32, i32) {
    %c0_i32 = arith.constant 0 : i32
    %c0_i32_0 = arith.constant 0 : i32
    return %arg0, %c0_i32 : i32, i32
  }
}

</mosaic_0001>

<bundles_post_ra>
// kernel: _generator_pallas.1
= control target key start
LH: loop header
LB: loop body
LE: loop exit
PB: predicated region body
PF: predicated region fallthrough
CT: control target
= control target key end

     0   :  { %s1021_s0 = inlined_call_operand.hbm [shape: f32[8,32], index: 0, kind: input, shape index: {}]   ;;  %s1022_s1 = inlined_call_operand.vmem [shape: f32[32,64], index: 1, kind: input, shape index: {}]   ;;  %s1023_s2 = inlined_call_operand.vmem [shape: f32[1,64], index: 2, kind: input, shape index: {}]   ;;  %s1024_s3 = inlined_call_operand.vmem [shape: f32[64,64], index: 3, kind: input, shape index: {}]   ;;  %s1025_s4 = inlined_call_operand.vmem [shape: f32[1,64], index: 4, kind: input, shape index: {}]   ;;  %s1026_s5 = inlined_call_operand.hbm [shape: f32[64,64], index: 5, kind: input, shape index: {}]   ;;  %s1027_s6 = inlined_call_operand.hbm [shape: f32[1,64], index: 6, kind: input, shape index: {}]   ;;  %s1028_s7 = inlined_call_operand.vmem [shape: f32[64,32], index: 7, kind: input, shape index: {}]   ;;  %s1029_s8 = inlined_call_operand.hbm [shape: f32[1,32], index: 8, kind: input, shape index: {}]   ;;  %s1030_s9 = inlined_call_operand.vmem [shape: f32[1,64], index: 9, kind: input, shape index: {}]   ;;  %s1031_s10 = inlined_call_operand.<no memory space> [shape: f32[1,1], index: 10, kind: input, shape index: {}]   ;;  %s1032_s11 = inlined_call_operand.hbm [shape: f32[8,32], index: 11, kind: output, shape index: {0}]   ;;  %s1033_s12 = inlined_call_operand.vmem [shape: f32[8,1], index: 12, kind: output, shape index: {1}]  }
   0x1   :  { %v18_v0 = vstv %s1031_s10 }
   0x2   :  { %19 = vst [vmem:[#allocation2] sm:$0x1] %v18_v0 }
   0x3   :  { %20 = vsyncpa [#allocation4], 0 }
   0x4   :  { %21 = vsyncpa [#allocation7], 0 }
   0x5   :  { %22 = vsyncpa [#allocation10], 0 }
   0x6   :  { %23 = vsyncpa [#allocation5], 0  ;;  %s787_s23 = smov [#allocation6]   ;;  %s669_s27 = scalar_lea.hbm %s1026_s5, 1024 }
   0x7   :  { %s47_s24 = sshll.u32 %s787_s23, 4  ;;  %p670_p0 = scmp.ne.s32.totalorder %s1026_s5, %s669_s27  ;;  %s48_s24 = int_to_ptr.vmem [resolvable:$true] %s47_s24 }
   0x8   :  { %p673_p1 = scmp.lt.u32.totalorder %s669_s27, %s1026_s5 }
   0xa   :  { %p675_p2 = pnand %p673_p1, %p670_p0 }
   0xc   :  { %678 = shalt.err (!%p675_p2)
}
   0xd   :  { %s679_s10 = scalar_lea.vmem %s48_s24, 1024  ;;  %p684_p4 = scmp.lt.s32.totalorder %s48_s24, %s48_s24 }
   0xe   :  { %p680_p3 = scmp.ne.s32.totalorder %s48_s24, %s679_s10  ;;  %p685_p5 = scmp.lt.s32.totalorder %s679_s10, %s679_s10 }
  0x10   :  { %p686_p6 = por %p685_p5, %p684_p4 }
  0x12   :  { %p687_p7 = pnand %p686_p6, %p680_p3 }
  0x14   :  { %690 = shalt.err (!%p687_p7)
}
  0x15   :  { %s788_s14 = smov 128   ;;  %s789_s15 = smov 8  }
  0x16   :  { %53 = dma.hbm_to_vmem [thread:$0]  %s1026_s5, 1024, %s48_s24, [#allocation7], %s788_s14, %s788_s14, %s789_s15  }
  0x17   :  { %s790_s18 = smov [#allocation3]   ;;  %s791_s20 = smov [#allocation8]  }
  0x18   :  { %s30_s19 = sshll.u32 %s790_s18, 4  ;;  %s60_s21 = sshll.u32 %s791_s20, 4  ;;  %s31_s19 = int_to_ptr.vmem [resolvable:$true] %s30_s19  ;;  %s61_s21 = int_to_ptr.vmem [resolvable:$true] %s60_s21 }
  0x19   :  { %s691_s25 = scalar_lea.hbm %s1021_s0, 128 }
  0x1a   :  { %p692_p8 = scmp.ne.s32.totalorder %s1021_s0, %s691_s25  ;;  %p695_p9 = scmp.lt.u32.totalorder %s691_s25, %s1021_s0 }
  0x1c   :  { %p697_p10 = pnand %p695_p9, %p692_p8 }
  0x1e   :  { %700 = shalt.err (!%p697_p10)
}
  0x1f   :  { %s701_s5 = scalar_lea.vmem %s31_s19, 128  ;;  %p706_p12 = scmp.lt.s32.totalorder %s31_s19, %s31_s19 }
  0x20   :  { %p702_p11 = scmp.ne.s32.totalorder %s31_s19, %s701_s5  ;;  %p707_p13 = scmp.lt.s32.totalorder %s701_s5, %s701_s5 }
  0x22   :  { %p708_p0 = por %p707_p13, %p706_p12 }
  0x24   :  { %p709_p1 = pnand %p708_p0, %p702_p11 }
  0x26   :  { %712 = shalt.err (!%p709_p1)
}
  0x27   :  { %33 = dma.hbm_to_vmem [thread:$0]  %s1021_s0, 128, %s31_s19, [#allocation4]  }
  0x28   :  { %s713_s14 = scalar_lea.hbm %s1027_s6, 16 }
  0x29   :  { %p714_p2 = scmp.ne.s32.totalorder %s1027_s6, %s713_s14  ;;  %p717_p3 = scmp.lt.u32.totalorder %s713_s14, %s1027_s6 }
  0x2b   :  { %p719_p4 = pnand %p717_p3, %p714_p2 }
  0x2d   :  { %722 = shalt.err (!%p719_p4)
}
  0x2e   :  { %s723_s20 = scalar_lea.vmem %s61_s21, 16  ;;  %s727_s22 = scalar_lea.vmem %s61_s21, 32 }
  0x2f   :  { %p724_p5 = scmp.ne.s32.totalorder %s61_s21, %s723_s20  ;;  %p728_p6 = scmp.lt.s32.totalorder %s61_s21, %s61_s21 }
  0x30   :  { %p729_p7 = scmp.lt.s32.totalorder %s727_s22, %s723_s20 }
  0x32   :  { %p730_p8 = por %p729_p7, %p728_p6 }
  0x34   :  { %p731_p9 = pnand %p730_p8, %p724_p5 }
  0x36   :  { %734 = shalt.err (!%p731_p9)
}
  0x37   :  { %63 = dma.hbm_to_vmem [thread:$0]  %s1027_s6, 16, %s61_s21, [#allocation7]  }
  0x38   :  { %s792_s23 = smov [#allocation9]   ;;  %s735_s28 = scalar_lea.hbm %s1029_s8, 16 }
  0x39   :  { %s72_s25 = sshll.u32 %s792_s23, 4  ;;  %p736_p10 = scmp.ne.s32.totalorder %s1029_s8, %s735_s28  ;;  %s73_s25 = int_to_ptr.vmem [resolvable:$true] %s72_s25 }
  0x3a   :  { %p739_p11 = scmp.lt.u32.totalorder %s735_s28, %s1029_s8 }
  0x3c   :  { %p741_p12 = pnand %p739_p11, %p736_p10 }
  0x3e   :  { %744 = shalt.err (!%p741_p12)
}
  0x3f   :  { %s745_s13 = scalar_lea.vmem %s73_s25, 16  ;;  %s749_s6 = scalar_lea.vmem %s73_s25, 32 }
  0x40   :  { %p746_p13 = scmp.ne.s32.totalorder %s73_s25, %s745_s13  ;;  %p750_p0 = scmp.lt.s32.totalorder %s73_s25, %s73_s25 }
  0x41   :  { %p751_p1 = scmp.lt.s32.totalorder %s749_s6, %s745_s13 }
  0x43   :  { %p752_p2 = por %p751_p1, %p750_p0 }
  0x45   :  { %p753_p3 = pnand %p752_p2, %p746_p13 }
  0x47   :  { %756 = shalt.err (!%p753_p3)
}
  0x48   :  { %75 = dma.hbm_to_vmem [thread:$0]  %s1029_s8, 16, %s73_s25, [#allocation10]  }
  0x49   :  { %779 = dma.done.wait [#allocation4], 128  }
  0x4a   :  { %780 = vsyncadd [#allocation4], 4294967168 }
  0x4b   :  { %781 = dma.done.wait [#allocation7], 1040  }
  0x4c   :  { %782 = vsyncadd [#allocation7], 4294966256 }
  0x4d   :  { %783 = dma.done.wait [#allocation10], 16  }
  0x4e   :  { %784 = vsyncadd [#allocation10], 4294967280  ;;  %v793_v1 = vmov 0.0|0.0   ;;  %vm794_vm0 = vmmov 0   ;;  %v795_v2 = vmov 0.0   ;;  %v93_v3 = vld [vmem:[%s1022_s1] sm:$0xff] }
  0x4f   :  { %613 = vmatprep.subr.bf16.mxu0 %v793_v1  ;;  %553 = vmatprep.mubr.msk.f32.mxu0 %vm794_vm0, %v795_v2  ;;  %v94_v4 = vld [vmem:[%s1022_s1 + $0x8] sm:$0xff]  ;;  %v95_v5 = vld [vmem:[%s1022_s1 + $0x10] sm:$0xff]  ;;  %v96_v7 = vld [vmem:[%s1022_s1 + $0x18] sm:$0xff]  ;;  %vm104_vm1 = vcmask 261120   ;;  %vm194_vm2 = vcmask 523264   ;;  %vm480_vm4 = vcmask 7168  }
  0x50   :  { %619 = vmatprep.subr.bf16.mxu1 %v793_v1  ;;  %572 = vmatprep.mubr.msk.f32.mxu1 %vm794_vm0, %v795_v2  ;;  %v614_v6 = vpack.c.bf16 %v94_v4, %v93_v3  ;;  %v179_v8 = vld [vmem:[%s1024_s3] sm:$0xff]  ;;  %v180_v9 = vld [vmem:[%s1024_s3 + $0x8] sm:$0xff]  ;;  %v181_v10 = vld [vmem:[%s1024_s3 + $0x10] sm:$0xff]  ;;  %v617_v12 = vpack.c.bf16 %v96_v7, %v95_v5  ;;  %s796_s30 = smov [#allocation11]  }
  0x51   :  { %v182_v11 = vld [vmem:[%s1024_s3 + $0x18] sm:$0xff]  ;;  %v620_v13 = vpack.c.bf16 %v180_v9, %v179_v8  ;;  %v183_v15 = vld [vmem:[%s1024_s3 + $0x20] sm:$0xff]  ;;  %v184_v16 = vld [vmem:[%s1024_s3 + $0x28] sm:$0xff]  ;;  %s488_s13 = sshll.u32 %s796_s30, 4  ;;  %s489_s13 = int_to_ptr.vmem [resolvable:$true] %s488_s13 }
  0x52   :  { %615 = vmatpush3.bf16.msra.mxu0 %v614_v6  ;;  %v623_v14 = vpack.c.bf16 %v182_v11, %v181_v10  ;;  %v92_v17 = vld [vmem:[#allocation3] sm:$0xff]  ;;  %v626_v18 = vpack.c.bf16 %v184_v16, %v183_v15  ;;  %v185_v19 = vld [vmem:[%s1024_s3 + $0x30] sm:$0xff]  ;;  %v186_v20 = vld [vmem:[%s1024_s3 + $0x38] sm:$0xff]  ;;  %s757_s6 = scalar_lea.vmem %s489_s13, 128  ;;  %p762_p5 = scmp.lt.s32.totalorder %s489_s13, %s489_s13 }
  0x53   :  { %616 = vmatprep.subr.bf16.mxu0 %v793_v1  ;;  %621 = vmatpush3.bf16.msra.mxu1 %v620_v13  ;;  %v629_v21 = vpack.c.bf16 %v186_v20, %v185_v19  ;;  %v269_v22 = vld [vmem:[#allocation6] sm:$0xff]  ;;  %v270_v23 = vld [vmem:[#allocation6 + $0x8] sm:$0xff]  ;;  %v271_v24 = vld [vmem:[#allocation6 + $0x10] sm:$0xff]  ;;  %p758_p4 = scmp.ne.s32.totalorder %s489_s13, %s757_s6  ;;  %p763_p6 = scmp.lt.s32.totalorder %s757_s6, %s757_s6 }
  0x54   :  { %622 = vmatprep.subr.bf16.mxu1 %v793_v1  ;;  %v632_v25 = vpack.c.bf16 %v270_v23, %v269_v22  ;;  %v272_v26 = vld [vmem:[#allocation6 + $0x18] sm:$0xff]  ;;  %v273_v28 = vld [vmem:[#allocation6 + $0x20] sm:$0xff]  ;;  %v274_v29 = vld [vmem:[#allocation6 + $0x28] sm:$0xff] }
  0x55   :  { %v635_v27 = vpack.c.bf16 %v272_v26, %v271_v24  ;;  %v638_v30 = vpack.c.bf16 %v274_v29, %v273_v28  ;;  %v503_v31 = vld [vmem:[%s1023_s2] ss:$0 sm:$0xff]  ;;  %v276_v37 = vld [vmem:[#allocation6 + $0x38] sm:$0xff]  ;;  %v360_v41 = vld [vmem:[%s1028_s7 + $0x10] sm:$0xff]  ;;  %p764_p7 = por %p763_p6, %p762_p5 }
  0x56   :  { %618 = vmatpush3.bf16.msra.mxu0 %v617_v12  ;;  %v275_v36 = vld [vmem:[#allocation6 + $0x30] sm:$0xff]  ;;  %v359_v40 = vld [vmem:[%s1028_s7 + $0x8] sm:$0xff]  ;;  %v364_v53 = vld [vmem:[%s1028_s7 + $0x30] sm:$0xff] }
  0x57   :  { %631 = vmatprep.subr.bf16.mxu0 %v793_v1  ;;  %624 = vmatpush3.bf16.msra.mxu1 %v623_v14  ;;  %v641_v38 = vpack.c.bf16 %v276_v37, %v275_v36  ;;  %v358_v39 = vld [vmem:[%s1028_s7] sm:$0xff]  ;;  %v361_v43 = vld [vmem:[%s1028_s7 + $0x18] sm:$0xff]  ;;  %v363_v46 = vld [vmem:[%s1028_s7 + $0x28] sm:$0xff]  ;;  %p765_p8 = pnand %p764_p7, %p758_p4 }
  0x58   :  { %625 = vmatprep.subr.bf16.mxu1 %v793_v1  ;;  %v644_v42 = vpack.c.bf16 %v359_v40, %v358_v39  ;;  %v647_v44 = vpack.c.bf16 %v361_v43, %v360_v41  ;;  %v362_v45 = vld [vmem:[%s1028_s7 + $0x20] sm:$0xff]  ;;  %v365_v54 = vld [vmem:[%s1028_s7 + $0x38] sm:$0xff]  ;;  %v507_v56 = vld [vmem:[#allocation8] ss:$0 sm:$0xff] }
  0x59   :  { %554 = vmatmul.mubr.msk.f32.vlgmr.msra.gmra.mrb[0].mxu0 %vm104_vm1, %v92_v17  ;;  %v650_v47 = vpack.c.bf16 %v363_v46, %v362_v45  ;;  %v505_v48 = vld [vmem:[%s1025_s4] ss:$0 sm:$0xff]  ;;  %v653_v55 = vpack.c.bf16 %v365_v54, %v364_v53  ;;  %v509_v15 = vld [vmem:[#allocation9] ss:$0 sm:$0xff] }
  0x5a   :  { %591 = vmatprep.mubr.msk.f32.mxu0 %vm794_vm0, %v795_v2  ;;  %633 = vmatpush3.bf16.msra.mxu0 %v632_v25  ;;  %v511_v60 = vld [vmem:[%s1030_s9] ss:$0 sm:$0xff] }
  0x5b   :  { %627 = vmatpush3.bf16.msra.mxu1 %v626_v18  ;;  %634 = vmatprep.subr.bf16.mxu0 %v793_v1  ;;  %v512_v0 = vld [vmem:[#allocation2] ss:$0 sm:$0xff] }
  0x5c   :  { %628 = vmatprep.subr.bf16.mxu1 %v793_v1 }
  0x5e   :  { %636 = vmatpush3.bf16.msra.mxu0 %v635_v27 }
  0x5f   :  { %630 = vmatpush3.bf16.msra.mxu1 %v629_v21  ;;  %637 = vmatprep.subr.bf16.mxu0 %v793_v1 }
  0x60   :  { %643 = vmatprep.subr.bf16.mxu1 %v793_v1 }
  0x62   :  { %639 = vmatpush3.bf16.msra.mxu0 %v638_v30 }
  0x63   :  { %640 = vmatprep.subr.bf16.mxu0 %v793_v1 }
  0x66   :  { %642 = vmatpush3.bf16.msra.mxu0 %v641_v38 }
 0x12c   :  { %v174_v32 = vpop.f32.mrb[0].mxu0 }
 0x12d   :  { %v175_v33 = vadd.f32 %v503_v31, %v174_v32  ;;  %v555_v34 = vpop.f32.mrb[1].mxu0 }
 0x12f   :  { %v178_v35 = vmax.f32 %v175_v33, 0.0 }
 0x131   :  { %573 = vmatmul.mubr.msk.f32.vlgmr.msra.gmra.mrb[0].mxu1 %vm194_vm2, %v178_v35 }
 0x132   :  { %610 = vmatprep.mubr.msk.f32.mxu1 %vm794_vm0, %v795_v2  ;;  %645 = vmatpush3.bf16.msra.mxu1 %v644_v42 }
 0x133   :  { %646 = vmatprep.subr.bf16.mxu1 %v793_v1 }
 0x136   :  { %648 = vmatpush3.bf16.msra.mxu1 %v647_v44 }
 0x137   :  { %649 = vmatprep.subr.bf16.mxu1 %v793_v1 }
 0x13a   :  { %651 = vmatpush3.bf16.msra.mxu1 %v650_v47 }
 0x13b   :  { %652 = vmatprep.subr.bf16.mxu1 %v793_v1 }
 0x13e   :  { %654 = vmatpush3.bf16.msra.mxu1 %v653_v55 }
 0x204   :  { %v264_v49 = vpop.f32.mrb[0].mxu1 }
 0x205   :  { %v265_v50 = vadd.f32 %v505_v48, %v264_v49  ;;  %v574_v51 = vpop.f32.mrb[1].mxu1 }
 0x207   :  { %v268_v52 = vmax.f32 %v265_v50, 0.0 }
 0x209   :  { %592 = vmatmul.mubr.msk.f32.vlgmr.msra.gmra.mrb[2].mxu0 %vm194_vm2, %v268_v52 }
 0x2dc   :  { %v353_v57 = vpop.f32.mrb[2].mxu0 }
 0x2dd   :  { %v354_v58 = vadd.f32 %v507_v56, %v353_v57  ;;  %v593_v59 = vpop.f32.mrb[3].mxu0 }
 0x2df   :  { %v357_v61 = vmax.f32 %v354_v58, 0.0 }
 0x2e1   :  { %611 = vmatmul.mubr.msk.f32.vlgmr.msra.gmra.mrb[2].mxu1 %vm194_vm2, %v357_v61  ;;  %v454_v62 = vmul.f32 %v511_v60, %v357_v61 }
 0x2e3   :  { %v455_v63 = vsel %vm194_vm2, %v454_v62, 0.0 }
 0x2e4   :  { %456 = vadd.xlane.f32.xlu0 %v455_v63 }
 0x371   :  { %v457_v1 = vpop.xlane.xlu0 %456 }
 0x372   :  { %v465_v2 = vadd.f32 %v512_v0, %v457_v1 }
 0x374   :  { %v467_v3 = vmin.f32 %v465_v2, 20.0  ;;  %vm466_vm5 = vcmp.gt.f32.partialorder %v465_v2, 20.0 }
 0x376   :  { %v468_v4 = vmul.f32 1.442695, %v467_v3 }
 0x378   :  { %665 = vpow2.f32 %v468_v4 }
 0x382   :  { %v666_v5 = vpop.eup %665 }
 0x383   :  { %v470_v6 = vadd.f32 1.0, %v666_v5  ;;  %v473_v7 = vmul.f32 -0.5, %v666_v5  ;;  %v476_v9 = vand.u32 2147483647, %v666_v5 }
 0x385   :  { %667 = vlog2.f32 %v470_v6  ;;  %v474_v8 = vadd.f32 1.0, %v473_v7  ;;  %vm477_vm3 = vcmp.lt.f32.partialorder %v476_v9, 0.0004427343 }
 0x387   :  { %v475_v12 = vmul.f32 %v666_v5, %v474_v8 }
 0x38f   :  { %v668_v10 = vpop.eup %667 }
 0x390   :  { %v472_v11 = vmul.f32 0.6931472, %v668_v10 }
 0x392   :  { %v478_v13 = vsel %vm477_vm3, %v475_v12, %v472_v11 }
 0x393   :  { %v479_v14 = vsel %vm466_vm5, %v465_v2, %v478_v13 }
 0x394   :  { %481 = vst.msk [vmem:[%s1033_s12] sm:$0xff] %vm480_vm4, %v479_v14 }
 0x3b4   :  { %v442_v16 = vpop.f32.mrb[2].mxu1 }
 0x3b5   :  { %v443_v17 = vadd.f32 %v509_v15, %v442_v16  ;;  %v612_v18 = vpop.f32.mrb[3].mxu1 }
 0x3b7   :  { %446 = vst.msk [vmem:[#allocation11] sm:$0xff] %vm104_vm1, %v443_v17 }
 0x3b8   :  { %768 = shalt.err (!%p765_p8)
}
 0x3b9   :  { %s769_s12 = scalar_lea.hbm %s1032_s11, 128 }
 0x3ba   :  { %p770_p9 = scmp.ne.s32.totalorder %s1032_s11, %s769_s12  ;;  %p773_p10 = scmp.lt.u32.totalorder %s769_s12, %s1032_s11 }
 0x3bc   :  { %p775_p11 = pnand %p773_p10, %p770_p9 }
 0x3be   :  { %778 = shalt.err (!%p775_p11)
}
 0x3bf   :  { %491 = dma.vmem_to_hbm [thread:$0]  %s489_s13, 128, %s1032_s11, [#allocation5]  }
 0x3c0   :  { %785 = dma.done.wait [#allocation5], 128  }
 0x3c1   :  { %786 = vsyncadd [#allocation5], 4294967168 }
 0x3c2   :  { %499 = vsyncpa [#allocation4], 1 }
 0x3c3   :  { %500 = vsyncpa [#allocation7], 1 }
 0x3c4   :  { %501 = vsyncpa [#allocation10], 1 }
 0x3c5   :  { %502 = vsyncpa [#allocation5], 1 }

</bundles_post_ra>
